<compile_context>
chip_gen: v6e
topology: v6e:2x2x1
jax: 0.10.0
libtpu: 0.0.40
codegen_flags: <defaults>
</compile_context>

<pallas_src>
import jax
import jax.numpy as jnp
from jax import lax
from jax.experimental import pallas as pl
from jax.experimental.pallas import tpu as pltpu

_BB = 8  # batch block (f32 sublane width)


def lstm_kernel(x_ref, wih_ref, b_ref, whh_ref, fcw_ref, fcb_ref, out_ref):
    # x_ref:   (T, BB, 1)  f32  input sequence block (input_size == 1)
    # wih_ref: (1, 4H)     f32  W_ih^T row, gate order [i, f, o, g]
    # b_ref:   (1, 4H)     f32  b_ih + b_hh, same gate order
    # whh_ref: (H, 4H)     bf16 W_hh^T, same gate order
    # fcw_ref: (1, H)      f32  fc.weight
    # fcb_ref: (1, 1)      f32  fc.bias
    # out_ref: (BB, 1)     f32
    T = x_ref.shape[0]
    B = x_ref.shape[1]
    H = whh_ref.shape[0]

    wih = wih_ref[...]   # (1, 4H) — 2 vregs, cheap to keep live
    b = b_ref[...]       # (1, 4H)

    def step(t, carry):
        h, c = carry
        # Recurrent matmul on the MXU in bf16 with f32 accumulation. W_hh is
        # re-loaded from VMEM each step (don't pin 8+ vregs across the unroll).
        rec = jnp.dot(h.astype(jnp.bfloat16), whh_ref[...],
                      preferred_element_type=jnp.float32)
        # In-kernel input projection: I == 1, so x @ W_ih^T is a broadcast multiply.
        gates = rec + x_ref[t] * wih + b                 # (B, 4H) f32
        sig = jax.nn.sigmoid(gates[:, : 3 * H])          # [i | f | o]
        i_g = sig[:, 0 * H:1 * H]
        f_g = sig[:, 1 * H:2 * H]
        o_g = sig[:, 2 * H:3 * H]
        g_g = jnp.tanh(gates[:, 3 * H:])
        c_new = f_g * c + i_g * g_g
        h_new = o_g * jnp.tanh(c_new)
        return (h_new, c_new)

    h0 = jnp.zeros((B, H), jnp.float32)
    c0 = jnp.zeros((B, H), jnp.float32)
    h_T, _ = lax.fori_loop(0, T, step, (h0, c0), unroll=True)

    # 1-wide FC as a VPU reduction (avoid a wasteful N=1 MXU matmul).
    out_ref[...] = jnp.sum(h_T * fcw_ref[...], axis=-1, keepdims=True) + fcb_ref[...]


def _permute_gates_ifog(w, H):
    """Permute the trailing 4H axis from PyTorch [i, f, g, o] to [i, f, o, g]."""
    return jnp.concatenate(
        [w[..., 0:2 * H], w[..., 3 * H:4 * H], w[..., 2 * H:3 * H]], axis=-1
    )


def prepare_params(params):
    """One-time parameter preprocessing (hoisted out of the per-call forward)."""
    w_ih, w_hh, b_ih, b_hh, fc_w, fc_b = (
        params["w_ih"], params["w_hh"], params["b_ih"],
        params["b_hh"], params["fc_w"], params["fc_b"],
    )
    H = w_hh.shape[1]
    assert w_ih.shape[1] == 1, "kernel exploits input_size == 1 (broadcast projection)"
    wih_row = _permute_gates_ifog(jnp.transpose(w_ih).astype(jnp.float32), H)  # (1, 4H)
    whh = _permute_gates_ifog(
        jnp.transpose(w_hh).astype(jnp.float32), H).astype(jnp.bfloat16)       # (H, 4H)
    b_row = _permute_gates_ifog(
        (b_ih + b_hh).astype(jnp.float32), H).reshape(1, 4 * H)                # (1, 4H)
    return {
        "wih": wih_row,
        "whh": whh,
        "b": b_row,
        "fcw": fc_w.astype(jnp.float32).reshape(1, H),
        "fcb": fc_b.astype(jnp.float32).reshape(1, 1),
    }


@jax.jit
def lstm_model_forward(x, prep):
    """x: (B, T, 1) float32. prep: output of prepare_params. Returns (B, 1) float32."""
    B, T, I = x.shape
    H = prep["fcw"].shape[1]
    B_pad = ((B + _BB - 1) // _BB) * _BB

    x_tbi = jnp.transpose(x, (1, 0, 2)).astype(jnp.float32)  # (T, B, 1)
    if B_pad != B:
        x_tbi = jnp.pad(x_tbi, ((0, 0), (0, B_pad - B), (0, 0)))

    out_pad = pl.pallas_call(
        lstm_kernel,
        out_shape=jax.ShapeDtypeStruct((B_pad, 1), jnp.float32),
        grid=(B_pad // _BB,),
        in_specs=[
            pl.BlockSpec((T, _BB, 1), lambda b: (0, b, 0)),
            pl.BlockSpec((1, 4 * H), lambda b: (0, 0)),
            pl.BlockSpec((1, 4 * H), lambda b: (0, 0)),
            pl.BlockSpec((H, 4 * H), lambda b: (0, 0)),
            pl.BlockSpec((1, H), lambda b: (0, 0)),
            pl.BlockSpec((1, 1), lambda b: (0, 0)),
        ],
        out_specs=pl.BlockSpec((_BB, 1), lambda b: (b, 0)),
        compiler_params=pltpu.CompilerParams(
            dimension_semantics=("parallel",)),  # batch blocks shard across v7x's 2 TCs
    )(x_tbi, prep["wih"], prep["b"], prep["whh"], prep["fcw"], prep["fcb"])
    return out_pad[:B]


def lstm_model_reference(x, params):
    """Pure-JAX f32 reference reproducing PyTorch LSTM + Linear semantics."""
    w_ih, w_hh, b_ih, b_hh, fc_w, fc_b = (
        params["w_ih"], params["w_hh"], params["b_ih"],
        params["b_hh"], params["fc_w"], params["fc_b"],
    )
    B, T, I = x.shape
    H = w_hh.shape[1]
    h = jnp.zeros((B, H), jnp.float32)
    c = jnp.zeros((B, H), jnp.float32)
    for t in range(T):
        gates = x[:, t, :] @ w_ih.T + b_ih + h @ w_hh.T + b_hh
        i_g = jax.nn.sigmoid(gates[:, 0 * H:1 * H])
        f_g = jax.nn.sigmoid(gates[:, 1 * H:2 * H])
        g_g = jnp.tanh(gates[:, 2 * H:3 * H])
        o_g = jax.nn.sigmoid(gates[:, 3 * H:4 * H])
        c = f_g * c + i_g * g_g
        h = o_g * jnp.tanh(c)
    return h @ fc_w.T + fc_b


def init_params(key, input_size=1, hidden_size=64):
    H, I = hidden_size, input_size
    k = 1.0 / jnp.sqrt(jnp.float32(H))
    keys = jax.random.split(key, 6)
    return {
        "w_ih": jax.random.uniform(keys[0], (4 * H, I), jnp.float32, -k, k),
        "w_hh": jax.random.uniform(keys[1], (4 * H, H), jnp.float32, -k, k),
        "b_ih": jax.random.uniform(keys[2], (4 * H,), jnp.float32, -k, k),
        "b_hh": jax.random.uniform(keys[3], (4 * H,), jnp.float32, -k, k),
        "fc_w": jax.random.uniform(keys[4], (1, H), jnp.float32, -k, k),
        "fc_b": jax.random.uniform(keys[5], (1,), jnp.float32, -k, k),
    }


if __name__ == "__main__":
    key = jax.random.PRNGKey(0)
    pkey, xkey = jax.random.split(key)

    B, T, I, H = 2, 8, 1, 64
    params = init_params(pkey, input_size=I, hidden_size=H)
    x = jax.random.normal(xkey, (B, T, I), jnp.float32)

    prep = prepare_params(params)          # one-time weight prep, outside the hot path
    out = lstm_model_forward(x, prep)
    out = jax.block_until_ready(out)

    ref = lstm_model_reference(x, params)
    assert out.shape == (B, 1)
    # Tolerance loosened because the recurrent matmul runs in bf16 (f32 accumulation).
    assert jnp.allclose(out, ref, atol=1e-2, rtol=1e-2), (out, ref)

    print("KERNEL_OK")
</pallas_src>

<mosaic_0001>
module attributes {stable_mosaic.version = 11 : i64} {
  func.func @lstm_kernel(%arg0: i32, %arg1: memref<8x8x1xf32, #tpu.memory_space<vmem>>, %arg2: memref<1x256xf32, #tpu.memory_space<vmem>>, %arg3: memref<1x256xf32, #tpu.memory_space<vmem>>, %arg4: memref<64x256xbf16, #tpu.memory_space<vmem>>, %arg5: memref<1x64xf32, #tpu.memory_space<vmem>>, %arg6: memref<1x1xf32, #tpu.memory_space<vmem>>, %arg7: memref<8x1xf32, #tpu.memory_space<vmem>>) attributes {dimension_semantics = [#tpu.dimension_semantics<parallel>], iteration_bounds = array<i64: 1>, scalar_prefetch = 0 : i64, scratch_operands = 0 : i64, tpu.core_type = #tpu.core_type<tc>, window_params = [{transform_indices = @transform_0, window_bounds = array<i64: 8, 8, 1>}, {pipeline_mode = #tpu.pipeline_mode<synchronous>, transform_indices = @transform_1, window_bounds = array<i64: 1, 256>}, {pipeline_mode = #tpu.pipeline_mode<synchronous>, transform_indices = @transform_2, window_bounds = array<i64: 1, 256>}, {pipeline_mode = #tpu.pipeline_mode<synchronous>, transform_indices = @transform_3, window_bounds = array<i64: 64, 256>}, {pipeline_mode = #tpu.pipeline_mode<synchronous>, transform_indices = @transform_4, window_bounds = array<i64: 1, 64>}, {pipeline_mode = #tpu.pipeline_mode<synchronous>, transform_indices = @transform_5, window_bounds = array<i64: 1, 1>}, {transform_indices = @transform_6, window_bounds = array<i64: 8, 1>}]} {
    %c0 = arith.constant 0 : index
    %c0_0 = arith.constant 0 : index
    %0 = vector.load %arg2[%c0, %c0_0] : memref<1x256xf32, #tpu.memory_space<vmem>>, vector<1x256xf32>
    %c0_1 = arith.constant 0 : index
    %c0_2 = arith.constant 0 : index
    %1 = vector.load %arg3[%c0_1, %c0_2] : memref<1x256xf32, #tpu.memory_space<vmem>>, vector<1x256xf32>
    %cst = arith.constant 0.000000e+00 : f32
    %2 = vector.broadcast %cst : f32 to vector<8x64xf32>
    %cst_3 = arith.constant 0.000000e+00 : f32
    %3 = vector.broadcast %cst_3 : f32 to vector<8x64xf32>
    %c0_i32 = arith.constant 0 : i32
    %4 = arith.truncf %2 : vector<8x64xf32> to vector<8x64xbf16>
    %c0_4 = arith.constant 0 : index
    %c0_5 = arith.constant 0 : index
    %5 = vector.load %arg4[%c0_4, %c0_5] : memref<64x256xbf16, #tpu.memory_space<vmem>>, vector<64x256xbf16>
    %cst_6 = arith.constant dense<0.000000e+00> : vector<8x256xf32>
    %6 = tpu.matmul %4, %5, %cst_6 {dimension_numbers = #tpu.dot_dimension_numbers<[1], [0], [0], [1], [0, 0, 1, 1], [], []>} : vector<8x64xbf16>, vector<64x256xbf16>, vector<8x256xf32> -> vector<8x256xf32>
    %7 = arith.index_cast %c0_i32 : i32 to index
    %c0_7 = arith.constant 0 : index
    %c0_8 = arith.constant 0 : index
    %8 = vector.load %arg1[%7, %c0_7, %c0_8] : memref<8x8x1xf32, #tpu.memory_space<vmem>>, vector<1x8x1xf32>
    %9 = vector.shape_cast %8 : vector<1x8x1xf32> to vector<8x1xf32>
    %10 = vector.broadcast %9 : vector<8x1xf32> to vector<8x256xf32>
    %11 = vector.broadcast %0 : vector<1x256xf32> to vector<8x256xf32>
    %12 = arith.mulf %10, %11 : vector<8x256xf32>
    %13 = arith.addf %6, %12 : vector<8x256xf32>
    %14 = vector.broadcast %1 : vector<1x256xf32> to vector<8x256xf32>
    %15 = arith.addf %13, %14 : vector<8x256xf32>
    %16 = vector.extract_strided_slice %15 {offsets = [0, 0], sizes = [8, 192], strides = [1, 1]} : vector<8x256xf32> to vector<8x192xf32>
    %17 = arith.negf %16 : vector<8x192xf32>
    %18 = math.exp %17 : vector<8x192xf32>
    %cst_9 = arith.constant 1.000000e+00 : f32
    %19 = vector.broadcast %cst_9 : f32 to vector<8x192xf32>
    %20 = arith.addf %19, %18 : vector<8x192xf32>
    %21 = arith.divf %19, %20 : vector<8x192xf32>
    %22 = vector.extract_strided_slice %21 {offsets = [0, 0], sizes = [8, 64], strides = [1, 1]} : vector<8x192xf32> to vector<8x64xf32>
    %23 = vector.extract_strided_slice %21 {offsets = [0, 64], sizes = [8, 64], strides = [1, 1]} : vector<8x192xf32> to vector<8x64xf32>
    %24 = vector.extract_strided_slice %21 {offsets = [0, 128], sizes = [8, 64], strides = [1, 1]} : vector<8x192xf32> to vector<8x64xf32>
    %25 = vector.extract_strided_slice %15 {offsets = [0, 192], sizes = [8, 64], strides = [1, 1]} : vector<8x256xf32> to vector<8x64xf32>
    %26 = math.tanh %25 : vector<8x64xf32>
    %27 = arith.mulf %23, %3 : vector<8x64xf32>
    %28 = arith.mulf %22, %26 : vector<8x64xf32>
    %29 = arith.addf %27, %28 : vector<8x64xf32>
    %30 = math.tanh %29 : vector<8x64xf32>
    %31 = arith.mulf %24, %30 : vector<8x64xf32>
    %c1_i32 = arith.constant 1 : i32
    %32 = arith.truncf %31 : vector<8x64xf32> to vector<8x64xbf16>
    %c0_10 = arith.constant 0 : index
    %c0_11 = arith.constant 0 : index
    %33 = vector.load %arg4[%c0_10, %c0_11] : memref<64x256xbf16, #tpu.memory_space<vmem>>, vector<64x256xbf16>
    %cst_12 = arith.constant dense<0.000000e+00> : vector<8x256xf32>
    %34 = tpu.matmul %32, %33, %cst_12 {dimension_numbers = #tpu.dot_dimension_numbers<[1], [0], [0], [1], [0, 0, 1, 1], [], []>} : vector<8x64xbf16>, vector<64x256xbf16>, vector<8x256xf32> -> vector<8x256xf32>
    %35 = arith.index_cast %c1_i32 : i32 to index
    %c0_13 = arith.constant 0 : index
    %c0_14 = arith.constant 0 : index
    %36 = vector.load %arg1[%35, %c0_13, %c0_14] : memref<8x8x1xf32, #tpu.memory_space<vmem>>, vector<1x8x1xf32>
    %37 = vector.shape_cast %36 : vector<1x8x1xf32> to vector<8x1xf32>
    %38 = vector.broadcast %37 : vector<8x1xf32> to vector<8x256xf32>
    %39 = vector.broadcast %0 : vector<1x256xf32> to vector<8x256xf32>
    %40 = arith.mulf %38, %39 : vector<8x256xf32>
    %41 = arith.addf %34, %40 : vector<8x256xf32>
    %42 = vector.broadcast %1 : vector<1x256xf32> to vector<8x256xf32>
    %43 = arith.addf %41, %42 : vector<8x256xf32>
    %44 = vector.extract_strided_slice %43 {offsets = [0, 0], sizes = [8, 192], strides = [1, 1]} : vector<8x256xf32> to vector<8x192xf32>
    %45 = arith.negf %44 : vector<8x192xf32>
    %46 = math.exp %45 : vector<8x192xf32>
    %cst_15 = arith.constant 1.000000e+00 : f32
    %47 = vector.broadcast %cst_15 : f32 to vector<8x192xf32>
    %48 = arith.addf %47, %46 : vector<8x192xf32>
    %49 = arith.divf %47, %48 : vector<8x192xf32>
    %50 = vector.extract_strided_slice %49 {offsets = [0, 0], sizes = [8, 64], strides = [1, 1]} : vector<8x192xf32> to vector<8x64xf32>
    %51 = vector.extract_strided_slice %49 {offsets = [0, 64], sizes = [8, 64], strides = [1, 1]} : vector<8x192xf32> to vector<8x64xf32>
    %52 = vector.extract_strided_slice %49 {offsets = [0, 128], sizes = [8, 64], strides = [1, 1]} : vector<8x192xf32> to vector<8x64xf32>
    %53 = vector.extract_strided_slice %43 {offsets = [0, 192], sizes = [8, 64], strides = [1, 1]} : vector<8x256xf32> to vector<8x64xf32>
    %54 = math.tanh %53 : vector<8x64xf32>
    %55 = arith.mulf %51, %29 : vector<8x64xf32>
    %56 = arith.mulf %50, %54 : vector<8x64xf32>
    %57 = arith.addf %55, %56 : vector<8x64xf32>
    %58 = math.tanh %57 : vector<8x64xf32>
    %59 = arith.mulf %52, %58 : vector<8x64xf32>
    %c2_i32 = arith.constant 2 : i32
    %60 = arith.truncf %59 : vector<8x64xf32> to vector<8x64xbf16>
    %c0_16 = arith.constant 0 : index
    %c0_17 = arith.constant 0 : index
    %61 = vector.load %arg4[%c0_16, %c0_17] : memref<64x256xbf16, #tpu.memory_space<vmem>>, vector<64x256xbf16>
    %cst_18 = arith.constant dense<0.000000e+00> : vector<8x256xf32>
    %62 = tpu.matmul %60, %61, %cst_18 {dimension_numbers = #tpu.dot_dimension_numbers<[1], [0], [0], [1], [0, 0, 1, 1], [], []>} : vector<8x64xbf16>, vector<64x256xbf16>, vector<8x256xf32> -> vector<8x256xf32>
    %63 = arith.index_cast %c2_i32 : i32 to index
    %c0_19 = arith.constant 0 : index
    %c0_20 = arith.constant 0 : index
    %64 = vector.load %arg1[%63, %c0_19, %c0_20] : memref<8x8x1xf32, #tpu.memory_space<vmem>>, vector<1x8x1xf32>
    %65 = vector.shape_cast %64 : vector<1x8x1xf32> to vector<8x1xf32>
    %66 = vector.broadcast %65 : vector<8x1xf32> to vector<8x256xf32>
    %67 = vector.broadcast %0 : vector<1x256xf32> to vector<8x256xf32>
    %68 = arith.mulf %66, %67 : vector<8x256xf32>
    %69 = arith.addf %62, %68 : vector<8x256xf32>
    %70 = vector.broadcast %1 : vector<1x256xf32> to vector<8x256xf32>
    %71 = arith.addf %69, %70 : vector<8x256xf32>
    %72 = vector.extract_strided_slice %71 {offsets = [0, 0], sizes = [8, 192], strides = [1, 1]} : vector<8x256xf32> to vector<8x192xf32>
    %73 = arith.negf %72 : vector<8x192xf32>
    %74 = math.exp %73 : vector<8x192xf32>
    %cst_21 = arith.constant 1.000000e+00 : f32
    %75 = vector.broadcast %cst_21 : f32 to vector<8x192xf32>
    %76 = arith.addf %75, %74 : vector<8x192xf32>
    %77 = arith.divf %75, %76 : vector<8x192xf32>
    %78 = vector.extract_strided_slice %77 {offsets = [0, 0], sizes = [8, 64], strides = [1, 1]} : vector<8x192xf32> to vector<8x64xf32>
    %79 = vector.extract_strided_slice %77 {offsets = [0, 64], sizes = [8, 64], strides = [1, 1]} : vector<8x192xf32> to vector<8x64xf32>
    %80 = vector.extract_strided_slice %77 {offsets = [0, 128], sizes = [8, 64], strides = [1, 1]} : vector<8x192xf32> to vector<8x64xf32>
    %81 = vector.extract_strided_slice %71 {offsets = [0, 192], sizes = [8, 64], strides = [1, 1]} : vector<8x256xf32> to vector<8x64xf32>
    %82 = math.tanh %81 : vector<8x64xf32>
    %83 = arith.mulf %79, %57 : vector<8x64xf32>
    %84 = arith.mulf %78, %82 : vector<8x64xf32>
    %85 = arith.addf %83, %84 : vector<8x64xf32>
    %86 = math.tanh %85 : vector<8x64xf32>
    %87 = arith.mulf %80, %86 : vector<8x64xf32>
    %c3_i32 = arith.constant 3 : i32
    %88 = arith.truncf %87 : vector<8x64xf32> to vector<8x64xbf16>
    %c0_22 = arith.constant 0 : index
    %c0_23 = arith.constant 0 : index
    %89 = vector.load %arg4[%c0_22, %c0_23] : memref<64x256xbf16, #tpu.memory_space<vmem>>, vector<64x256xbf16>
    %cst_24 = arith.constant dense<0.000000e+00> : vector<8x256xf32>
    %90 = tpu.matmul %88, %89, %cst_24 {dimension_numbers = #tpu.dot_dimension_numbers<[1], [0], [0], [1], [0, 0, 1, 1], [], []>} : vector<8x64xbf16>, vector<64x256xbf16>, vector<8x256xf32> -> vector<8x256xf32>
    %91 = arith.index_cast %c3_i32 : i32 to index
    %c0_25 = arith.constant 0 : index
    %c0_26 = arith.constant 0 : index
    %92 = vector.load %arg1[%91, %c0_25, %c0_26] : memref<8x8x1xf32, #tpu.memory_space<vmem>>, vector<1x8x1xf32>
    %93 = vector.shape_cast %92 : vector<1x8x1xf32> to vector<8x1xf32>
    %94 = vector.broadcast %93 : vector<8x1xf32> to vector<8x256xf32>
    %95 = vector.broadcast %0 : vector<1x256xf32> to vector<8x256xf32>
    %96 = arith.mulf %94, %95 : vector<8x256xf32>
    %97 = arith.addf %90, %96 : vector<8x256xf32>
    %98 = vector.broadcast %1 : vector<1x256xf32> to vector<8x256xf32>
    %99 = arith.addf %97, %98 : vector<8x256xf32>
    %100 = vector.extract_strided_slice %99 {offsets = [0, 0], sizes = [8, 192], strides = [1, 1]} : vector<8x256xf32> to vector<8x192xf32>
    %101 = arith.negf %100 : vector<8x192xf32>
    %102 = math.exp %101 : vector<8x192xf32>
    %cst_27 = arith.constant 1.000000e+00 : f32
    %103 = vector.broadcast %cst_27 : f32 to vector<8x192xf32>
    %104 = arith.addf %103, %102 : vector<8x192xf32>
    %105 = arith.divf %103, %104 : vector<8x192xf32>
    %106 = vector.extract_strided_slice %105 {offsets = [0, 0], sizes = [8, 64], strides = [1, 1]} : vector<8x192xf32> to vector<8x64xf32>
    %107 = vector.extract_strided_slice %105 {offsets = [0, 64], sizes = [8, 64], strides = [1, 1]} : vector<8x192xf32> to vector<8x64xf32>
    %108 = vector.extract_strided_slice %105 {offsets = [0, 128], sizes = [8, 64], strides = [1, 1]} : vector<8x192xf32> to vector<8x64xf32>
    %109 = vector.extract_strided_slice %99 {offsets = [0, 192], sizes = [8, 64], strides = [1, 1]} : vector<8x256xf32> to vector<8x64xf32>
    %110 = math.tanh %109 : vector<8x64xf32>
    %111 = arith.mulf %107, %85 : vector<8x64xf32>
    %112 = arith.mulf %106, %110 : vector<8x64xf32>
    %113 = arith.addf %111, %112 : vector<8x64xf32>
    %114 = math.tanh %113 : vector<8x64xf32>
    %115 = arith.mulf %108, %114 : vector<8x64xf32>
    %c4_i32 = arith.constant 4 : i32
    %116 = arith.truncf %115 : vector<8x64xf32> to vector<8x64xbf16>
    %c0_28 = arith.constant 0 : index
    %c0_29 = arith.constant 0 : index
    %117 = vector.load %arg4[%c0_28, %c0_29] : memref<64x256xbf16, #tpu.memory_space<vmem>>, vector<64x256xbf16>
    %cst_30 = arith.constant dense<0.000000e+00> : vector<8x256xf32>
    %118 = tpu.matmul %116, %117, %cst_30 {dimension_numbers = #tpu.dot_dimension_numbers<[1], [0], [0], [1], [0, 0, 1, 1], [], []>} : vector<8x64xbf16>, vector<64x256xbf16>, vector<8x256xf32> -> vector<8x256xf32>
    %119 = arith.index_cast %c4_i32 : i32 to index
    %c0_31 = arith.constant 0 : index
    %c0_32 = arith.constant 0 : index
    %120 = vector.load %arg1[%119, %c0_31, %c0_32] : memref<8x8x1xf32, #tpu.memory_space<vmem>>, vector<1x8x1xf32>
    %121 = vector.shape_cast %120 : vector<1x8x1xf32> to vector<8x1xf32>
    %122 = vector.broadcast %121 : vector<8x1xf32> to vector<8x256xf32>
    %123 = vector.broadcast %0 : vector<1x256xf32> to vector<8x256xf32>
    %124 = arith.mulf %122, %123 : vector<8x256xf32>
    %125 = arith.addf %118, %124 : vector<8x256xf32>
    %126 = vector.broadcast %1 : vector<1x256xf32> to vector<8x256xf32>
    %127 = arith.addf %125, %126 : vector<8x256xf32>
    %128 = vector.extract_strided_slice %127 {offsets = [0, 0], sizes = [8, 192], strides = [1, 1]} : vector<8x256xf32> to vector<8x192xf32>
    %129 = arith.negf %128 : vector<8x192xf32>
    %130 = math.exp %129 : vector<8x192xf32>
    %cst_33 = arith.constant 1.000000e+00 : f32
    %131 = vector.broadcast %cst_33 : f32 to vector<8x192xf32>
    %132 = arith.addf %131, %130 : vector<8x192xf32>
    %133 = arith.divf %131, %132 : vector<8x192xf32>
    %134 = vector.extract_strided_slice %133 {offsets = [0, 0], sizes = [8, 64], strides = [1, 1]} : vector<8x192xf32> to vector<8x64xf32>
    %135 = vector.extract_strided_slice %133 {offsets = [0, 64], sizes = [8, 64], strides = [1, 1]} : vector<8x192xf32> to vector<8x64xf32>
    %136 = vector.extract_strided_slice %133 {offsets = [0, 128], sizes = [8, 64], strides = [1, 1]} : vector<8x192xf32> to vector<8x64xf32>
    %137 = vector.extract_strided_slice %127 {offsets = [0, 192], sizes = [8, 64], strides = [1, 1]} : vector<8x256xf32> to vector<8x64xf32>
    %138 = math.tanh %137 : vector<8x64xf32>
    %139 = arith.mulf %135, %113 : vector<8x64xf32>
    %140 = arith.mulf %134, %138 : vector<8x64xf32>
    %141 = arith.addf %139, %140 : vector<8x64xf32>
    %142 = math.tanh %141 : vector<8x64xf32>
    %143 = arith.mulf %136, %142 : vector<8x64xf32>
    %c5_i32 = arith.constant 5 : i32
    %144 = arith.truncf %143 : vector<8x64xf32> to vector<8x64xbf16>
    %c0_34 = arith.constant 0 : index
    %c0_35 = arith.constant 0 : index
    %145 = vector.load %arg4[%c0_34, %c0_35] : memref<64x256xbf16, #tpu.memory_space<vmem>>, vector<64x256xbf16>
    %cst_36 = arith.constant dense<0.000000e+00> : vector<8x256xf32>
    %146 = tpu.matmul %144, %145, %cst_36 {dimension_numbers = #tpu.dot_dimension_numbers<[1], [0], [0], [1], [0, 0, 1, 1], [], []>} : vector<8x64xbf16>, vector<64x256xbf16>, vector<8x256xf32> -> vector<8x256xf32>
    %147 = arith.index_cast %c5_i32 : i32 to index
    %c0_37 = arith.constant 0 : index
    %c0_38 = arith.constant 0 : index
    %148 = vector.load %arg1[%147, %c0_37, %c0_38] : memref<8x8x1xf32, #tpu.memory_space<vmem>>, vector<1x8x1xf32>
    %149 = vector.shape_cast %148 : vector<1x8x1xf32> to vector<8x1xf32>
    %150 = vector.broadcast %149 : vector<8x1xf32> to vector<8x256xf32>
    %151 = vector.broadcast %0 : vector<1x256xf32> to vector<8x256xf32>
    %152 = arith.mulf %150, %151 : vector<8x256xf32>
    %153 = arith.addf %146, %152 : vector<8x256xf32>
    %154 = vector.broadcast %1 : vector<1x256xf32> to vector<8x256xf32>
    %155 = arith.addf %153, %154 : vector<8x256xf32>
    %156 = vector.extract_strided_slice %155 {offsets = [0, 0], sizes = [8, 192], strides = [1, 1]} : vector<8x256xf32> to vector<8x192xf32>
    %157 = arith.negf %156 : vector<8x192xf32>
    %158 = math.exp %157 : vector<8x192xf32>
    %cst_39 = arith.constant 1.000000e+00 : f32
    %159 = vector.broadcast %cst_39 : f32 to vector<8x192xf32>
    %160 = arith.addf %159, %158 : vector<8x192xf32>
    %161 = arith.divf %159, %160 : vector<8x192xf32>
    %162 = vector.extract_strided_slice %161 {offsets = [0, 0], sizes = [8, 64], strides = [1, 1]} : vector<8x192xf32> to vector<8x64xf32>
    %163 = vector.extract_strided_slice %161 {offsets = [0, 64], sizes = [8, 64], strides = [1, 1]} : vector<8x192xf32> to vector<8x64xf32>
    %164 = vector.extract_strided_slice %161 {offsets = [0, 128], sizes = [8, 64], strides = [1, 1]} : vector<8x192xf32> to vector<8x64xf32>
    %165 = vector.extract_strided_slice %155 {offsets = [0, 192], sizes = [8, 64], strides = [1, 1]} : vector<8x256xf32> to vector<8x64xf32>
    %166 = math.tanh %165 : vector<8x64xf32>
    %167 = arith.mulf %163, %141 : vector<8x64xf32>
    %168 = arith.mulf %162, %166 : vector<8x64xf32>
    %169 = arith.addf %167, %168 : vector<8x64xf32>
    %170 = math.tanh %169 : vector<8x64xf32>
    %171 = arith.mulf %164, %170 : vector<8x64xf32>
    %c6_i32 = arith.constant 6 : i32
    %172 = arith.truncf %171 : vector<8x64xf32> to vector<8x64xbf16>
    %c0_40 = arith.constant 0 : index
    %c0_41 = arith.constant 0 : index
    %173 = vector.load %arg4[%c0_40, %c0_41] : memref<64x256xbf16, #tpu.memory_space<vmem>>, vector<64x256xbf16>
    %cst_42 = arith.constant dense<0.000000e+00> : vector<8x256xf32>
    %174 = tpu.matmul %172, %173, %cst_42 {dimension_numbers = #tpu.dot_dimension_numbers<[1], [0], [0], [1], [0, 0, 1, 1], [], []>} : vector<8x64xbf16>, vector<64x256xbf16>, vector<8x256xf32> -> vector<8x256xf32>
    %175 = arith.index_cast %c6_i32 : i32 to index
    %c0_43 = arith.constant 0 : index
    %c0_44 = arith.constant 0 : index
    %176 = vector.load %arg1[%175, %c0_43, %c0_44] : memref<8x8x1xf32, #tpu.memory_space<vmem>>, vector<1x8x1xf32>
    %177 = vector.shape_cast %176 : vector<1x8x1xf32> to vector<8x1xf32>
    %178 = vector.broadcast %177 : vector<8x1xf32> to vector<8x256xf32>
    %179 = vector.broadcast %0 : vector<1x256xf32> to vector<8x256xf32>
    %180 = arith.mulf %178, %179 : vector<8x256xf32>
    %181 = arith.addf %174, %180 : vector<8x256xf32>
    %182 = vector.broadcast %1 : vector<1x256xf32> to vector<8x256xf32>
    %183 = arith.addf %181, %182 : vector<8x256xf32>
    %184 = vector.extract_strided_slice %183 {offsets = [0, 0], sizes = [8, 192], strides = [1, 1]} : vector<8x256xf32> to vector<8x192xf32>
    %185 = arith.negf %184 : vector<8x192xf32>
    %186 = math.exp %185 : vector<8x192xf32>
    %cst_45 = arith.constant 1.000000e+00 : f32
    %187 = vector.broadcast %cst_45 : f32 to vector<8x192xf32>
    %188 = arith.addf %187, %186 : vector<8x192xf32>
    %189 = arith.divf %187, %188 : vector<8x192xf32>
    %190 = vector.extract_strided_slice %189 {offsets = [0, 0], sizes = [8, 64], strides = [1, 1]} : vector<8x192xf32> to vector<8x64xf32>
    %191 = vector.extract_strided_slice %189 {offsets = [0, 64], sizes = [8, 64], strides = [1, 1]} : vector<8x192xf32> to vector<8x64xf32>
    %192 = vector.extract_strided_slice %189 {offsets = [0, 128], sizes = [8, 64], strides = [1, 1]} : vector<8x192xf32> to vector<8x64xf32>
    %193 = vector.extract_strided_slice %183 {offsets = [0, 192], sizes = [8, 64], strides = [1, 1]} : vector<8x256xf32> to vector<8x64xf32>
    %194 = math.tanh %193 : vector<8x64xf32>
    %195 = arith.mulf %191, %169 : vector<8x64xf32>
    %196 = arith.mulf %190, %194 : vector<8x64xf32>
    %197 = arith.addf %195, %196 : vector<8x64xf32>
    %198 = math.tanh %197 : vector<8x64xf32>
    %199 = arith.mulf %192, %198 : vector<8x64xf32>
    %c7_i32 = arith.constant 7 : i32
    %200 = arith.truncf %199 : vector<8x64xf32> to vector<8x64xbf16>
    %c0_46 = arith.constant 0 : index
    %c0_47 = arith.constant 0 : index
    %201 = vector.load %arg4[%c0_46, %c0_47] : memref<64x256xbf16, #tpu.memory_space<vmem>>, vector<64x256xbf16>
    %cst_48 = arith.constant dense<0.000000e+00> : vector<8x256xf32>
    %202 = tpu.matmul %200, %201, %cst_48 {dimension_numbers = #tpu.dot_dimension_numbers<[1], [0], [0], [1], [0, 0, 1, 1], [], []>} : vector<8x64xbf16>, vector<64x256xbf16>, vector<8x256xf32> -> vector<8x256xf32>
    %203 = arith.index_cast %c7_i32 : i32 to index
    %c0_49 = arith.constant 0 : index
    %c0_50 = arith.constant 0 : index
    %204 = vector.load %arg1[%203, %c0_49, %c0_50] : memref<8x8x1xf32, #tpu.memory_space<vmem>>, vector<1x8x1xf32>
    %205 = vector.shape_cast %204 : vector<1x8x1xf32> to vector<8x1xf32>
    %206 = vector.broadcast %205 : vector<8x1xf32> to vector<8x256xf32>
    %207 = vector.broadcast %0 : vector<1x256xf32> to vector<8x256xf32>
    %208 = arith.mulf %206, %207 : vector<8x256xf32>
    %209 = arith.addf %202, %208 : vector<8x256xf32>
    %210 = vector.broadcast %1 : vector<1x256xf32> to vector<8x256xf32>
    %211 = arith.addf %209, %210 : vector<8x256xf32>
    %212 = vector.extract_strided_slice %211 {offsets = [0, 0], sizes = [8, 192], strides = [1, 1]} : vector<8x256xf32> to vector<8x192xf32>
    %213 = arith.negf %212 : vector<8x192xf32>
    %214 = math.exp %213 : vector<8x192xf32>
    %cst_51 = arith.constant 1.000000e+00 : f32
    %215 = vector.broadcast %cst_51 : f32 to vector<8x192xf32>
    %216 = arith.addf %215, %214 : vector<8x192xf32>
    %217 = arith.divf %215, %216 : vector<8x192xf32>
    %218 = vector.extract_strided_slice %217 {offsets = [0, 0], sizes = [8, 64], strides = [1, 1]} : vector<8x192xf32> to vector<8x64xf32>
    %219 = vector.extract_strided_slice %217 {offsets = [0, 64], sizes = [8, 64], strides = [1, 1]} : vector<8x192xf32> to vector<8x64xf32>
    %220 = vector.extract_strided_slice %217 {offsets = [0, 128], sizes = [8, 64], strides = [1, 1]} : vector<8x192xf32> to vector<8x64xf32>
    %221 = vector.extract_strided_slice %211 {offsets = [0, 192], sizes = [8, 64], strides = [1, 1]} : vector<8x256xf32> to vector<8x64xf32>
    %222 = math.tanh %221 : vector<8x64xf32>
    %223 = arith.mulf %219, %197 : vector<8x64xf32>
    %224 = arith.mulf %218, %222 : vector<8x64xf32>
    %225 = arith.addf %223, %224 : vector<8x64xf32>
    %226 = math.tanh %225 : vector<8x64xf32>
    %227 = arith.mulf %220, %226 : vector<8x64xf32>
    %c8_i32 = arith.constant 8 : i32
    %c0_52 = arith.constant 0 : index
    %c0_53 = arith.constant 0 : index
    %228 = vector.load %arg5[%c0_52, %c0_53] : memref<1x64xf32, #tpu.memory_space<vmem>>, vector<1x64xf32>
    %229 = vector.broadcast %228 : vector<1x64xf32> to vector<8x64xf32>
    %230 = arith.mulf %227, %229 : vector<8x64xf32>
    %cst_54 = arith.constant dense<0.000000e+00> : vector<8xf32>
    %231 = vector.multi_reduction <add>, %230, %cst_54 [1] : vector<8x64xf32> to vector<8xf32>
    %232 = vector.shape_cast %231 : vector<8xf32> to vector<8x1xf32>
    %c0_55 = arith.constant 0 : index
    %c0_56 = arith.constant 0 : index
    %233 = vector.load %arg6[%c0_55, %c0_56] : memref<1x1xf32, #tpu.memory_space<vmem>>, vector<1x1xf32>
    %234 = vector.broadcast %233 : vector<1x1xf32> to vector<8x1xf32>
    %235 = arith.addf %232, %234 : vector<8x1xf32>
    %c0_57 = arith.constant 0 : index
    %c0_58 = arith.constant 0 : index
    %236 = vector.load %arg7[%c0_57, %c0_58] : memref<8x1xf32, #tpu.memory_space<vmem>>, vector<8x1xf32>
    tpu.vector_store %arg7[%c0_57, %c0_58], %235 {strides = array<i32>} : memref<8x1xf32, #tpu.memory_space<vmem>>, vector<8x1xf32>,
    return
  }
  func.func @transform_0(%arg0: i32) -> (i32, i32, i32) {
    %c0_i32 = arith.constant 0 : i32
    %c0_i32_0 = arith.constant 0 : i32
    %c0_i32_1 = arith.constant 0 : i32
    return %c0_i32, %arg0, %c0_i32_0 : i32, i32, i32
  }
  func.func @transform_1(%arg0: i32) -> (i32, i32) {
    %c0_i32 = arith.constant 0 : i32
    %c0_i32_0 = arith.constant 0 : i32
    %c0_i32_1 = arith.constant 0 : i32
    return %c0_i32, %c0_i32_0 : i32, i32
  }
  func.func @transform_2(%arg0: i32) -> (i32, i32) {
    %c0_i32 = arith.constant 0 : i32
    %c0_i32_0 = arith.constant 0 : i32
    %c0_i32_1 = arith.constant 0 : i32
    return %c0_i32, %c0_i32_0 : i32, i32
  }
  func.func @transform_3(%arg0: i32) -> (i32, i32) {
    %c0_i32 = arith.constant 0 : i32
    %c0_i32_0 = arith.constant 0 : i32
    %c0_i32_1 = arith.constant 0 : i32
    return %c0_i32, %c0_i32_0 : i32, i32
  }
  func.func @transform_4(%arg0: i32) -> (i32, i32) {
    %c0_i32 = arith.constant 0 : i32
    %c0_i32_0 = arith.constant 0 : i32
    %c0_i32_1 = arith.constant 0 : i32
    return %c0_i32, %c0_i32_0 : i32, i32
  }
  func.func @transform_5(%arg0: i32) -> (i32, i32) {
    %c0_i32 = arith.constant 0 : i32
    %c0_i32_0 = arith.constant 0 : i32
    %c0_i32_1 = arith.constant 0 : i32
    return %c0_i32, %c0_i32_0 : i32, i32
  }
  func.func @transform_6(%arg0: i32) -> (i32, i32) {
    %c0_i32 = arith.constant 0 : i32
    %c0_i32_0 = arith.constant 0 : i32
    return %arg0, %c0_i32 : i32, i32
  }
}

</mosaic_0001>

<bundles_post_ra>
// kernel: lstm_model_forward.1
= control target key start
LH: loop header
LB: loop body
LE: loop exit
PB: predicated region body
PF: predicated region fallthrough
CT: control target
= control target key end

     0   :  { %v43_v0 = vlaneseq  ;;  %v961_v2 = vmov 0   ;;  %vm95_vm0 = vcmask 523264   ;;  %vm804_vm1 = vcmask 7168   ;;  %s1223_s3 = inlined_call_operand.vmem [shape: bf16[64,256], index: 3, kind: input, shape index: {}]   ;;  %s1224_s0 = inlined_call_operand.vmem [shape: f32[8,8,1], index: 0, kind: input, shape index: {}]   ;;  %s1225_s1 = inlined_call_operand.vmem [shape: f32[1,256], index: 1, kind: input, shape index: {}]   ;;  %s1226_s2 = inlined_call_operand.vmem [shape: f32[1,256], index: 2, kind: input, shape index: {}]   ;;  %s1227_s5 = inlined_call_operand.<no memory space> [shape: f32[1,1], index: 5, kind: input, shape index: {}]   ;;  %s1228_s4 = inlined_call_operand.vmem [shape: f32[1,64], index: 4, kind: input, shape index: {}]   ;;  %s1229_s6 = inlined_call_operand.vmem [shape: f32[8,1], index: 6, kind: output, shape index: {}]  }
   0x1   :  { %v1001_v1 = vld [vmem:[%s1223_s3 + $0x34] ss:$8 sps:$4 sm:$0xff]   ;;  %131 = vmatprep.mubr.bf16.mxu0 %v961_v2  ;;  %852 = vset.pattern.permute.xlu0 %v961_v2  ;;  %v1008_v3 = vld [vmem:[%s1223_s3 + $0x30] ss:$8 sps:$4 sm:$0xff]   ;;  %v1015_v5 = vld [vmem:[%s1223_s3 + $0x24] ss:$8 sps:$4 sm:$0xff]  }
   0x2   :  { %v44_v4 = vshrl.u32 %v43_v0, 7  ;;  %228 = vmatprep.mubr.bf16.mxu1 %v961_v2  ;;  %107 = vmatprep.subr.bf16.mxu0 %v1001_v1  ;;  %v1022_v6 = vld [vmem:[%s1223_s3 + $0x20] ss:$8 sps:$4 sm:$0xff]   ;;  %v1029_v8 = vld [vmem:[%s1223_s3 + $0x14] ss:$8 sps:$4 sm:$0xff]  }
   0x3   :  { %204 = vmatprep.subr.bf16.mxu1 %v1001_v1  ;;  %108 = vmatpush1.bf16.msra.mxu0 %v1008_v3  ;;  %v36_v9 = vld [vmem:[%s1224_s0] sm:$0xff]  ;;  %v1044_v12 = vld [vmem:[%s1223_s3 + $0x10] ss:$8 sps:$4 sm:$0xff]   ;;  %v820_v29 = vld [vmem:[%s1224_s0 + $0x8] sm:$0xff] }
   0x4   :  { %v45_v7 = vsub.s32 0, %v44_v4  ;;  %205 = vmatpush1.bf16.msra.mxu1 %v1008_v3  ;;  %109 = vmatprep.subr.bf16.mxu0 %v1015_v5  ;;  %v26_v10 = vld [vmem:[%s1225_s1] sm:$0x3]  ;;  %v1051_v13 = vld [vmem:[%s1223_s3 + $0x4] ss:$8 sps:$4 sm:$0xff]   ;;  %v49_v17 = vsub.s32 1, %v44_v4 }
   0x5   :  { %206 = vmatprep.subr.bf16.mxu1 %v1015_v5  ;;  %39 = vperm.xlu0 %852, %v36_v9   ;;  %v1058_v14 = vld [vmem:[%s1223_s3] ss:$8 sps:$4 sm:$0xff]  }
   0x6   :  { %v1038_v11 = vrot.slane %v26_v10, %v45_v7  ;;  %v27_v15 = vld [vmem:[%s1226_s2] sm:$0x3]  ;;  %v1082_v18 = vrot.slane %v26_v10, %v49_v17  ;;  %s962_s2 = smov 64   ;;  %v824_v10 = vld [vmem:[%s1224_s0 + $0x10] sm:$0xff] }
   0x7   :  { %110 = vmatpush1.bf16.msra.mxu0 %v1022_v6  ;;  %v1080_v16 = vrot.slane %v27_v15, %v45_v7  ;;  %v1085_v22 = vrot.slane %v27_v15, %v49_v17 }
   0x8   :  { %207 = vmatpush1.bf16.msra.mxu1 %v1022_v6  ;;  %111 = vmatprep.subr.bf16.mxu0 %v1029_v8 }
   0x9   :  { %208 = vmatprep.subr.bf16.mxu1 %v1029_v8 }
   0xb   :  { %112 = vmatpush1.bf16.msra.mxu0 %v1044_v12 }
   0xc   :  { %209 = vmatpush1.bf16.msra.mxu1 %v1044_v12  ;;  %113 = vmatprep.subr.bf16.mxu0 %v1051_v13 }
   0xd   :  { %210 = vmatprep.subr.bf16.mxu1 %v1051_v13 }
   0xf   :  { %114 = vmatpush1.bf16.msra.mxu0 %v1058_v14 }
  0x10   :  { %211 = vmatpush1.bf16.msra.mxu1 %v1058_v14  ;;  %290 = vmatprep.subr.bf16.mxu0 %v1001_v1 }
  0x11   :  { %376 = vmatprep.subr.bf16.mxu1 %v1001_v1 }
  0x12   :  { %132 = vmatmul.mubr.bf16.vlgmr.msra.gmra.mxu0 %v961_v2 }
  0x13   :  { %291 = vmatpush1.bf16.msra.mxu0 %v1008_v3  ;;  %314 = vmatprep.mubr.bf16.mxu0 %v961_v2 }
  0x14   :  { %292 = vmatprep.subr.bf16.mxu0 %v1015_v5 }
  0x17   :  { %293 = vmatpush1.bf16.msra.mxu0 %v1022_v6 }
  0x18   :  { %294 = vmatprep.subr.bf16.mxu0 %v1029_v8 }
  0x1b   :  { %295 = vmatpush1.bf16.msra.mxu0 %v1044_v12 }
  0x1c   :  { %296 = vmatprep.subr.bf16.mxu0 %v1051_v13 }
  0x1f   :  { %297 = vmatpush1.bf16.msra.mxu0 %v1058_v14 }
  0x20   :  { %462 = vmatprep.subr.bf16.mxu0 %v1001_v1 }
  0x80   :  { %v40_v19 = vpop.permute.xlu0 %39 }
  0x81   :  { %v54_v20 = vmul.f32 %v1082_v18, %v40_v19  ;;  %v53_v30 = vmul.f32 %v1038_v11, %v40_v19 }
  0xd2   :  { %v133_v21 = vpop.f32.mrf.mxu0 }
  0xd3   :  { %v134_v31 = vadd.f32 %v133_v21, %v53_v30 }
  0xd4   :  { %v135_v23 = vpop.f32.mrf.mxu0 }
  0xd5   :  { %v136_v24 = vadd.f32 %v135_v23, %v54_v20  ;;  %v151_v32 = vadd.f32 %v1080_v16, %v134_v31 }
  0xd6   :  { %v137_v25 = vpop.f32.mrf.mxu0 }
  0xd7   :  { %v152_v26 = vadd.f32 %v1085_v22, %v136_v24  ;;  %v818_v33 = vmul.f32 -1.442695, %v151_v32 }
  0xd8   :  { %v138_v27 = vpop.f32.mrf.mxu0 }
  0xd9   :  { %865 = vtanh.f32 %v152_v26  ;;  %v819_v43 = vmul.f32 -1.442695, %v152_v26 }
  0xda   :  { %867 = vpow2.f32 %v818_v33 }
  0xe6   :  { %v866_v28 = vpop.eup %865 }
  0xe7   :  { %168 = vrot.lane.b32.xlu0 %v866_v28, %s962_s2  ;;  %v868_v34 = vpop.eup %867 }
  0xe8   :  { %v159_v35 = vadd.f32 1.0, %v868_v34 }
  0xea   :  { %869 = vrcp.f32 %v159_v35 }
  0xeb   :  { %188 = vperm.xlu0 %852, %v820_v29  }
  0xf7   :  { %v870_v36 = vpop.eup %869 }
  0xf8   :  { %v166_v39 = vmul.f32 0.0, %v870_v36 }
 0x159   :  { %v169_v37 = vpop.permute.xlu0 %168 }
 0x15a   :  { %v171_v38 = vmul.f32 %v870_v36, %v169_v37 }
 0x15c   :  { %173 = vrot.lane.b32.xlu1 %v171_v38, %s962_s2 }
 0x166   :  { %v189_v50 = vpop.permute.xlu0 %188 }
 0x167   :  { %v192_v52 = vmul.f32 %v189_v50, %v1082_v18  ;;  %v191_v59 = vmul.f32 %v189_v50, %v1038_v11 }
 0x1ce   :  { %v174_v40 = vpop.permute.xlu1 %173 }
 0x1cf   :  { %v176_v41 = vadd.f32 %v174_v40, %v166_v39 }
 0x1d1   :  { %871 = vtanh.f32 %v176_v41 }
 0x1d2   :  { %873 = vpow2.f32 %v819_v43 }
 0x1de   :  { %v872_v42 = vpop.eup %871 }
 0x1df   :  { %179 = vrot.lane.b32.xlu1 %v872_v42, %s962_s2  ;;  %v874_v44 = vpop.eup %873 }
 0x1e0   :  { %v160_v45 = vadd.f32 1.0, %v874_v44 }
 0x1e2   :  { %875 = vrcp.f32 %v160_v45 }
 0x1ef   :  { %v876_v46 = vpop.eup %875 }
 0x251   :  { %v180_v47 = vpop.permute.xlu1 %179 }
 0x252   :  { %v182_v48 = vmul.f32 %v876_v46, %v180_v47  ;;  %v828_v47 = vld [vmem:[%s1224_s0 + $0x18] sm:$0xff] }
 0x254   :  { %v183_v49 = vpack.c.bf16 %v182_v48, %v182_v48 }
 0x256   :  { %821 = vmatmul.mubr.msk.bf16.vlgmr.msra.gmra.mxu1 %vm95_vm0, %v183_v49 }
 0x257   :  { %377 = vmatpush1.bf16.msra.mxu1 %v1008_v3  ;;  %400 = vmatprep.mubr.bf16.mxu1 %v961_v2 }
 0x258   :  { %378 = vmatprep.subr.bf16.mxu1 %v1015_v5 }
 0x25b   :  { %379 = vmatpush1.bf16.msra.mxu1 %v1022_v6 }
 0x25c   :  { %380 = vmatprep.subr.bf16.mxu1 %v1029_v8 }
 0x25f   :  { %381 = vmatpush1.bf16.msra.mxu1 %v1044_v12 }
 0x260   :  { %382 = vmatprep.subr.bf16.mxu1 %v1051_v13 }
 0x263   :  { %383 = vmatpush1.bf16.msra.mxu1 %v1058_v14 }
 0x264   :  { %548 = vmatprep.subr.bf16.mxu1 %v1001_v1 }
 0x316   :  { %v230_v51 = vpop.f32.mrf.mxu1 }
 0x317   :  { %v231_v60 = vadd.f32 %v230_v51, %v191_v59 }
 0x318   :  { %v232_v53 = vpop.f32.mrf.mxu1 }
 0x319   :  { %v233_v54 = vadd.f32 %v232_v53, %v192_v52  ;;  %v237_v61 = vadd.f32 %v231_v60, %v1080_v16 }
 0x31a   :  { %v234_v55 = vpop.f32.mrf.mxu1 }
 0x31b   :  { %v238_v56 = vadd.f32 %v233_v54, %v1085_v22  ;;  %v822_v62 = vmul.f32 -1.442695, %v237_v61 }
 0x31c   :  { %v235_v57 = vpop.f32.mrf.mxu1 }
 0x31d   :  { %877 = vtanh.f32 %v238_v56  ;;  %v823_v21 = vmul.f32 -1.442695, %v238_v56 }
 0x31e   :  { %879 = vpow2.f32 %v822_v62 }
 0x32a   :  { %v878_v58 = vpop.eup %877 }
 0x32b   :  { %254 = vrot.lane.b32.xlu1 %v878_v58, %s962_s2  ;;  %v880_v63 = vpop.eup %879 }
 0x32c   :  { %v245_v0 = vadd.f32 1.0, %v880_v63 }
 0x32e   :  { %881 = vrcp.f32 %v245_v0 }
 0x33b   :  { %v882_v4 = vpop.eup %881 }
 0x33c   :  { %v252_v15 = vmul.f32 %v882_v4, %v176_v41 }
 0x39d   :  { %v255_v7 = vpop.permute.xlu1 %254 }
 0x39e   :  { %v257_v9 = vmul.f32 %v882_v4, %v255_v7 }
 0x3a0   :  { %259 = vrot.lane.b32.xlu0 %v257_v9, %s962_s2 }
 0x3a4   :  { %274 = vperm.xlu0 %852, %v824_v10  }
 0x412   :  { %v260_v17 = vpop.permute.xlu0 %259 }
 0x413   :  { %v262_v19 = vadd.f32 %v260_v17, %v252_v15 }
 0x415   :  { %883 = vtanh.f32 %v262_v19 }
 0x416   :  { %885 = vpow2.f32 %v823_v21 }
 0x41f   :  { %v275_v29 = vpop.permute.xlu0 %274 }
 0x420   :  { %v278_v31 = vmul.f32 %v275_v29, %v1082_v18  ;;  %v277_v38 = vmul.f32 %v275_v29, %v1038_v11 }
 0x422   :  { %v884_v20 = vpop.eup %883 }
 0x423   :  { %265 = vrot.lane.b32.xlu1 %v884_v20, %s962_s2  ;;  %v886_v23 = vpop.eup %885 }
 0x424   :  { %v246_v24 = vadd.f32 1.0, %v886_v23 }
 0x426   :  { %887 = vrcp.f32 %v246_v24 }
 0x433   :  { %v888_v25 = vpop.eup %887 }
 0x495   :  { %v266_v26 = vpop.permute.xlu1 %265 }
 0x496   :  { %v268_v27 = vmul.f32 %v888_v25, %v266_v26  ;;  %v832_v25 = vld [vmem:[%s1224_s0 + $0x20] sm:$0xff] }
 0x498   :  { %v269_v28 = vpack.c.bf16 %v268_v27, %v268_v27 }
 0x49a   :  { %825 = vmatmul.mubr.msk.bf16.vlgmr.msra.gmra.mxu0 %vm95_vm0, %v269_v28 }
 0x49b   :  { %463 = vmatpush1.bf16.msra.mxu0 %v1008_v3  ;;  %486 = vmatprep.mubr.bf16.mxu0 %v961_v2 }
 0x49c   :  { %464 = vmatprep.subr.bf16.mxu0 %v1015_v5 }
 0x49f   :  { %465 = vmatpush1.bf16.msra.mxu0 %v1022_v6 }
 0x4a0   :  { %466 = vmatprep.subr.bf16.mxu0 %v1029_v8 }
 0x4a3   :  { %467 = vmatpush1.bf16.msra.mxu0 %v1044_v12 }
 0x4a4   :  { %468 = vmatprep.subr.bf16.mxu0 %v1051_v13 }
 0x4a7   :  { %469 = vmatpush1.bf16.msra.mxu0 %v1058_v14 }
 0x4a8   :  { %634 = vmatprep.subr.bf16.mxu0 %v1001_v1 }
 0x55a   :  { %v316_v30 = vpop.f32.mrf.mxu0 }
 0x55b   :  { %v317_v39 = vadd.f32 %v316_v30, %v277_v38 }
 0x55c   :  { %v318_v32 = vpop.f32.mrf.mxu0 }
 0x55d   :  { %v319_v33 = vadd.f32 %v318_v32, %v278_v31  ;;  %v323_v40 = vadd.f32 %v317_v39, %v1080_v16 }
 0x55e   :  { %v320_v34 = vpop.f32.mrf.mxu0 }
 0x55f   :  { %v324_v35 = vadd.f32 %v319_v33, %v1085_v22  ;;  %v826_v41 = vmul.f32 -1.442695, %v323_v40 }
 0x560   :  { %v321_v36 = vpop.f32.mrf.mxu0 }
 0x561   :  { %889 = vtanh.f32 %v324_v35  ;;  %v827_v52 = vmul.f32 -1.442695, %v324_v35 }
 0x562   :  { %891 = vpow2.f32 %v826_v41 }
 0x56e   :  { %v890_v37 = vpop.eup %889 }
 0x56f   :  { %340 = vrot.lane.b32.xlu1 %v890_v37, %s962_s2  ;;  %v892_v42 = vpop.eup %891 }
 0x570   :  { %v331_v43 = vadd.f32 1.0, %v892_v42 }
 0x572   :  { %893 = vrcp.f32 %v331_v43 }
 0x57f   :  { %v894_v44 = vpop.eup %893 }
 0x580   :  { %v338_v48 = vmul.f32 %v894_v44, %v262_v19 }
 0x5e1   :  { %v341_v45 = vpop.permute.xlu1 %340 }
 0x5e2   :  { %v343_v46 = vmul.f32 %v894_v44, %v341_v45 }
 0x5e4   :  { %345 = vrot.lane.b32.xlu0 %v343_v46, %s962_s2 }
 0x5e8   :  { %360 = vperm.xlu0 %852, %v828_v47  }
 0x656   :  { %v346_v49 = vpop.permute.xlu0 %345 }
 0x657   :  { %v348_v50 = vadd.f32 %v346_v49, %v338_v48 }
 0x659   :  { %895 = vtanh.f32 %v348_v50 }
 0x65a   :  { %897 = vpow2.f32 %v827_v52 }
 0x663   :  { %v361_v59 = vpop.permute.xlu0 %360 }
 0x664   :  { %v364_v61 = vmul.f32 %v361_v59, %v1082_v18  ;;  %v363_v10 = vmul.f32 %v361_v59, %v1038_v11 }
 0x666   :  { %v896_v51 = vpop.eup %895 }
 0x667   :  { %351 = vrot.lane.b32.xlu1 %v896_v51, %s962_s2  ;;  %v898_v53 = vpop.eup %897 }
 0x668   :  { %v332_v54 = vadd.f32 1.0, %v898_v53 }
 0x66a   :  { %899 = vrcp.f32 %v332_v54 }
 0x677   :  { %v900_v55 = vpop.eup %899 }
 0x6d9   :  { %v352_v56 = vpop.permute.xlu1 %351 }
 0x6da   :  { %v354_v57 = vmul.f32 %v900_v55, %v352_v56  ;;  %v836_v55 = vld [vmem:[%s1224_s0 + $0x28] sm:$0xff] }
 0x6dc   :  { %v355_v58 = vpack.c.bf16 %v354_v57, %v354_v57 }
 0x6de   :  { %829 = vmatmul.mubr.msk.bf16.vlgmr.msra.gmra.mxu1 %vm95_vm0, %v355_v58 }
 0x6df   :  { %549 = vmatpush1.bf16.msra.mxu1 %v1008_v3  ;;  %572 = vmatprep.mubr.bf16.mxu1 %v961_v2 }
 0x6e0   :  { %550 = vmatprep.subr.bf16.mxu1 %v1015_v5 }
 0x6e3   :  { %551 = vmatpush1.bf16.msra.mxu1 %v1022_v6 }
 0x6e4   :  { %552 = vmatprep.subr.bf16.mxu1 %v1029_v8 }
 0x6e7   :  { %553 = vmatpush1.bf16.msra.mxu1 %v1044_v12 }
 0x6e8   :  { %554 = vmatprep.subr.bf16.mxu1 %v1051_v13 }
 0x6eb   :  { %555 = vmatpush1.bf16.msra.mxu1 %v1058_v14 }
 0x6ec   :  { %720 = vmatprep.subr.bf16.mxu1 %v1001_v1 }
 0x79e   :  { %v402_v60 = vpop.f32.mrf.mxu1 }
 0x79f   :  { %v403_v15 = vadd.f32 %v402_v60, %v363_v10 }
 0x7a0   :  { %v404_v62 = vpop.f32.mrf.mxu1 }
 0x7a1   :  { %v405_v63 = vadd.f32 %v404_v62, %v364_v61  ;;  %v409_v17 = vadd.f32 %v403_v15, %v1080_v16 }
 0x7a2   :  { %v406_v0 = vpop.f32.mrf.mxu1 }
 0x7a3   :  { %v410_v4 = vadd.f32 %v405_v63, %v1085_v22  ;;  %v830_v1 = vmul.f32 -1.442695, %v409_v17 }
 0x7a4   :  { %v407_v7 = vpop.f32.mrf.mxu1 }
 0x7a5   :  { %901 = vtanh.f32 %v410_v4  ;;  %v831_v30 = vmul.f32 -1.442695, %v410_v4 }
 0x7a6   :  { %903 = vpow2.f32 %v830_v1 }
 0x7b2   :  { %v902_v9 = vpop.eup %901 }
 0x7b3   :  { %426 = vrot.lane.b32.xlu1 %v902_v9, %s962_s2  ;;  %v904_v19 = vpop.eup %903 }
 0x7b4   :  { %v417_v20 = vadd.f32 1.0, %v904_v19 }
 0x7b6   :  { %905 = vrcp.f32 %v417_v20 }
 0x7c3   :  { %v906_v21 = vpop.eup %905 }
 0x7c4   :  { %v424_v26 = vmul.f32 %v906_v21, %v348_v50 }
 0x825   :  { %v427_v23 = vpop.permute.xlu1 %426 }
 0x826   :  { %v429_v24 = vmul.f32 %v906_v21, %v427_v23 }
 0x828   :  { %431 = vrot.lane.b32.xlu0 %v429_v24, %s962_s2 }
 0x82c   :  { %446 = vperm.xlu0 %852, %v832_v25   ;;  %v840_v25 = vld [vmem:[%s1224_s0 + $0x30] sm:$0xff] }
 0x89a   :  { %v432_v27 = vpop.permute.xlu0 %431 }
 0x89b   :  { %v434_v28 = vadd.f32 %v432_v27, %v424_v26 }
 0x89d   :  { %907 = vtanh.f32 %v434_v28 }
 0x89e   :  { %909 = vpow2.f32 %v831_v30 }
 0x8a7   :  { %v447_v37 = vpop.permute.xlu0 %446 }
 0x8a8   :  { %v450_v39 = vmul.f32 %v447_v37, %v1082_v18  ;;  %v449_v46 = vmul.f32 %v447_v37, %v1038_v11 }
 0x8aa   :  { %v908_v29 = vpop.eup %907 }
 0x8ab   :  { %437 = vrot.lane.b32.xlu1 %v908_v29, %s962_s2  ;;  %v910_v31 = vpop.eup %909 }
 0x8ac   :  { %v418_v32 = vadd.f32 1.0, %v910_v31 }
 0x8ae   :  { %911 = vrcp.f32 %v418_v32 }
 0x8bb   :  { %v912_v33 = vpop.eup %911 }
 0x91d   :  { %v438_v34 = vpop.permute.xlu1 %437 }
 0x91e   :  { %v440_v35 = vmul.f32 %v912_v33, %v438_v34 }
 0x920   :  { %v441_v36 = vpack.c.bf16 %v440_v35, %v440_v35 }
 0x922   :  { %833 = vmatmul.mubr.msk.bf16.vlgmr.msra.gmra.mxu0 %vm95_vm0, %v441_v36 }
 0x923   :  { %635 = vmatpush1.bf16.msra.mxu0 %v1008_v3  ;;  %658 = vmatprep.mubr.bf16.mxu0 %v961_v2 }
 0x924   :  { %636 = vmatprep.subr.bf16.mxu0 %v1015_v5 }
 0x927   :  { %637 = vmatpush1.bf16.msra.mxu0 %v1022_v6 }
 0x928   :  { %638 = vmatprep.subr.bf16.mxu0 %v1029_v8 }
 0x92b   :  { %639 = vmatpush1.bf16.msra.mxu0 %v1044_v12 }
 0x92c   :  { %640 = vmatprep.subr.bf16.mxu0 %v1051_v13 }
 0x92f   :  { %641 = vmatpush1.bf16.msra.mxu0 %v1058_v14 }
 0x9e2   :  { %v488_v38 = vpop.f32.mrf.mxu0 }
 0x9e3   :  { %v489_v47 = vadd.f32 %v488_v38, %v449_v46 }
 0x9e4   :  { %v490_v40 = vpop.f32.mrf.mxu0 }
 0x9e5   :  { %v491_v41 = vadd.f32 %v490_v40, %v450_v39  ;;  %v495_v48 = vadd.f32 %v489_v47, %v1080_v16 }
 0x9e6   :  { %v492_v42 = vpop.f32.mrf.mxu0 }
 0x9e7   :  { %v496_v43 = vadd.f32 %v491_v41, %v1085_v22  ;;  %v834_v49 = vmul.f32 -1.442695, %v495_v48 }
 0x9e8   :  { %v493_v44 = vpop.f32.mrf.mxu0 }
 0x9e9   :  { %913 = vtanh.f32 %v496_v43  ;;  %v835_v60 = vmul.f32 -1.442695, %v496_v43 }
 0x9ea   :  { %915 = vpow2.f32 %v834_v49 }
 0x9f6   :  { %v914_v45 = vpop.eup %913 }
 0x9f7   :  { %512 = vrot.lane.b32.xlu1 %v914_v45, %s962_s2  ;;  %v916_v50 = vpop.eup %915 }
 0x9f8   :  { %v503_v51 = vadd.f32 1.0, %v916_v50 }
 0x9fa   :  { %917 = vrcp.f32 %v503_v51 }
 0xa07   :  { %v918_v52 = vpop.eup %917 }
 0xa08   :  { %v510_v56 = vmul.f32 %v918_v52, %v434_v28 }
 0xa69   :  { %v513_v53 = vpop.permute.xlu1 %512 }
 0xa6a   :  { %v515_v54 = vmul.f32 %v918_v52, %v513_v53 }
 0xa6c   :  { %517 = vrot.lane.b32.xlu0 %v515_v54, %s962_s2 }
 0xa70   :  { %532 = vperm.xlu0 %852, %v836_v55   ;;  %v844_v55 = vld [vmem:[%s1224_s0 + $0x38] sm:$0xff] }
 0xade   :  { %v518_v57 = vpop.permute.xlu0 %517 }
 0xadf   :  { %v520_v58 = vadd.f32 %v518_v57, %v510_v56 }
 0xae1   :  { %919 = vtanh.f32 %v520_v58 }
 0xae2   :  { %921 = vpow2.f32 %v835_v60 }
 0xaeb   :  { %v533_v9 = vpop.permute.xlu0 %532 }
 0xaec   :  { %v536_v15 = vmul.f32 %v533_v9, %v1082_v18 }
 0xaee   :  { %v920_v59 = vpop.eup %919 }
 0xaef   :  { %523 = vrot.lane.b32.xlu1 %v920_v59, %s962_s2  ;;  %v922_v61 = vpop.eup %921 }
 0xaf0   :  { %v504_v62 = vadd.f32 1.0, %v922_v61 }
 0xaf2   :  { %923 = vrcp.f32 %v504_v62 }
 0xaff   :  { %v924_v63 = vpop.eup %923 }
 0xb61   :  { %v524_v0 = vpop.permute.xlu1 %523 }
 0xb62   :  { %v526_v4 = vmul.f32 %v924_v63, %v524_v0 }
 0xb64   :  { %v527_v7 = vpack.c.bf16 %v526_v4, %v526_v4 }
 0xb66   :  { %837 = vmatmul.mubr.msk.bf16.vlgmr.msra.gmra.mxu1 %vm95_vm0, %v527_v7 }
 0xb67   :  { %721 = vmatpush1.bf16.msra.mxu1 %v1008_v3  ;;  %744 = vmatprep.mubr.bf16.mxu1 %v961_v2 }
 0xb68   :  { %722 = vmatprep.subr.bf16.mxu1 %v1015_v5 }
 0xb6b   :  { %723 = vmatpush1.bf16.msra.mxu1 %v1022_v6 }
 0xb6c   :  { %724 = vmatprep.subr.bf16.mxu1 %v1029_v8  ;;  %v535_v8 = vmul.f32 %v533_v9, %v1038_v11 }
 0xb6f   :  { %725 = vmatpush1.bf16.msra.mxu1 %v1044_v12 }
 0xb70   :  { %726 = vmatprep.subr.bf16.mxu1 %v1051_v13 }
 0xb73   :  { %727 = vmatpush1.bf16.msra.mxu1 %v1058_v14 }
 0xc26   :  { %v574_v10 = vpop.f32.mrf.mxu1 }
 0xc27   :  { %v575_v12 = vadd.f32 %v574_v10, %v535_v8 }
 0xc28   :  { %v576_v17 = vpop.f32.mrf.mxu1 }
 0xc29   :  { %v577_v3 = vadd.f32 %v576_v17, %v536_v15  ;;  %v581_v13 = vadd.f32 %v575_v12, %v1080_v16 }
 0xc2a   :  { %v578_v1 = vpop.f32.mrf.mxu1 }
 0xc2b   :  { %v582_v2 = vadd.f32 %v577_v3, %v1085_v22  ;;  %v838_v14 = vmul.f32 -1.442695, %v581_v13 }
 0xc2c   :  { %v579_v5 = vpop.f32.mrf.mxu1 }
 0xc2d   :  { %925 = vtanh.f32 %v582_v2  ;;  %v839_v30 = vmul.f32 -1.442695, %v582_v2 }
 0xc2e   :  { %927 = vpow2.f32 %v838_v14 }
 0xc3a   :  { %v926_v6 = vpop.eup %925 }
 0xc3b   :  { %598 = vrot.lane.b32.xlu1 %v926_v6, %s962_s2  ;;  %v928_v19 = vpop.eup %927 }
 0xc3c   :  { %v589_v20 = vadd.f32 1.0, %v928_v19 }
 0xc3e   :  { %929 = vrcp.f32 %v589_v20 }
 0xc4b   :  { %v930_v21 = vpop.eup %929 }
 0xc4c   :  { %v596_v26 = vmul.f32 %v930_v21, %v520_v58 }
 0xcad   :  { %v599_v23 = vpop.permute.xlu1 %598 }
 0xcae   :  { %v601_v24 = vmul.f32 %v930_v21, %v599_v23 }
 0xcb0   :  { %603 = vrot.lane.b32.xlu0 %v601_v24, %s962_s2 }
 0xcb4   :  { %618 = vperm.xlu0 %852, %v840_v25  }
 0xd22   :  { %v604_v27 = vpop.permute.xlu0 %603 }
 0xd23   :  { %v606_v28 = vadd.f32 %v604_v27, %v596_v26 }
 0xd25   :  { %931 = vtanh.f32 %v606_v28 }
 0xd26   :  { %933 = vpow2.f32 %v839_v30 }
 0xd2f   :  { %v619_v37 = vpop.permute.xlu0 %618 }
 0xd30   :  { %v622_v39 = vmul.f32 %v619_v37, %v1082_v18  ;;  %v621_v46 = vmul.f32 %v619_v37, %v1038_v11 }
 0xd32   :  { %v932_v29 = vpop.eup %931 }
 0xd33   :  { %609 = vrot.lane.b32.xlu1 %v932_v29, %s962_s2  ;;  %v934_v31 = vpop.eup %933 }
 0xd34   :  { %v590_v32 = vadd.f32 1.0, %v934_v31  ;;  %v848_v31 = vld [vmem:[%s1228_s4] ss:$0 sm:$0xff] }
 0xd36   :  { %935 = vrcp.f32 %v590_v32 }
 0xd43   :  { %v936_v33 = vpop.eup %935 }
 0xda5   :  { %v610_v34 = vpop.permute.xlu1 %609 }
 0xda6   :  { %v612_v35 = vmul.f32 %v936_v33, %v610_v34 }
 0xda8   :  { %v613_v36 = vpack.c.bf16 %v612_v35, %v612_v35 }
 0xdaa   :  { %841 = vmatmul.mubr.msk.bf16.vlgmr.msra.gmra.mxu0 %vm95_vm0, %v613_v36 }
 0xe6a   :  { %v660_v38 = vpop.f32.mrf.mxu0 }
 0xe6b   :  { %v661_v47 = vadd.f32 %v660_v38, %v621_v46 }
 0xe6c   :  { %v662_v40 = vpop.f32.mrf.mxu0 }
 0xe6d   :  { %v663_v41 = vadd.f32 %v662_v40, %v622_v39  ;;  %v667_v48 = vadd.f32 %v661_v47, %v1080_v16 }
 0xe6e   :  { %v664_v42 = vpop.f32.mrf.mxu0 }
 0xe6f   :  { %v668_v43 = vadd.f32 %v663_v41, %v1085_v22  ;;  %v842_v49 = vmul.f32 -1.442695, %v667_v48 }
 0xe70   :  { %v665_v44 = vpop.f32.mrf.mxu0 }
 0xe71   :  { %937 = vtanh.f32 %v668_v43  ;;  %v843_v60 = vmul.f32 -1.442695, %v668_v43 }
 0xe72   :  { %939 = vpow2.f32 %v842_v49 }
 0xe7e   :  { %v938_v45 = vpop.eup %937 }
 0xe7f   :  { %684 = vrot.lane.b32.xlu1 %v938_v45, %s962_s2  ;;  %v940_v50 = vpop.eup %939 }
 0xe80   :  { %v675_v51 = vadd.f32 1.0, %v940_v50 }
 0xe82   :  { %941 = vrcp.f32 %v675_v51 }
 0xe8f   :  { %v942_v52 = vpop.eup %941 }
 0xe90   :  { %v682_v56 = vmul.f32 %v942_v52, %v606_v28 }
 0xef1   :  { %v685_v53 = vpop.permute.xlu1 %684 }
 0xef2   :  { %v687_v54 = vmul.f32 %v942_v52, %v685_v53 }
 0xef4   :  { %689 = vrot.lane.b32.xlu0 %v687_v54, %s962_s2 }
 0xef8   :  { %704 = vperm.xlu0 %852, %v844_v55  }
 0xf66   :  { %v690_v57 = vpop.permute.xlu0 %689 }
 0xf67   :  { %v692_v58 = vadd.f32 %v690_v57, %v682_v56 }
 0xf69   :  { %943 = vtanh.f32 %v692_v58 }
 0xf6a   :  { %945 = vpow2.f32 %v843_v60 }
 0xf73   :  { %v705_v9 = vpop.permute.xlu0 %704 }
 0xf74   :  { %v708_v15 = vmul.f32 %v705_v9, %v1082_v18  ;;  %v707_v8 = vmul.f32 %v705_v9, %v1038_v11  ;;  %v11_v11 = vstv %s1227_s5 }
 0xf75   :  { %12 = vst [vmem:[#allocation2] sm:$0x1] %v11_v11 }
 0xf76   :  { %v944_v59 = vpop.eup %943 }
 0xf77   :  { %695 = vrot.lane.b32.xlu1 %v944_v59, %s962_s2  ;;  %v946_v61 = vpop.eup %945 }
 0xf78   :  { %v676_v62 = vadd.f32 1.0, %v946_v61 }
 0xf7a   :  { %947 = vrcp.f32 %v676_v62 }
 0xf7c   :  { %v849_v35 = vld [vmem:[#allocation2] ss:$0 sm:$0xff] }
 0xf87   :  { %v948_v63 = vpop.eup %947 }
 0xfe9   :  { %v696_v0 = vpop.permute.xlu1 %695 }
 0xfea   :  { %v698_v4 = vmul.f32 %v948_v63, %v696_v0 }
 0xfec   :  { %v699_v7 = vpack.c.bf16 %v698_v4, %v698_v4 }
 0xfee   :  { %845 = vmatmul.mubr.msk.bf16.vlgmr.msra.gmra.mxu1 %vm95_vm0, %v699_v7 }
0x10ae   :  { %v746_v10 = vpop.f32.mrf.mxu1 }
0x10af   :  { %v747_v12 = vadd.f32 %v746_v10, %v707_v8 }
0x10b0   :  { %v748_v17 = vpop.f32.mrf.mxu1 }
0x10b1   :  { %v749_v3 = vadd.f32 %v748_v17, %v708_v15  ;;  %v753_v13 = vadd.f32 %v747_v12, %v1080_v16 }
0x10b2   :  { %v750_v1 = vpop.f32.mrf.mxu1 }
0x10b3   :  { %v754_v2 = vadd.f32 %v749_v3, %v1085_v22  ;;  %v846_v14 = vmul.f32 -1.442695, %v753_v13 }
0x10b4   :  { %v751_v5 = vpop.f32.mrf.mxu1 }
0x10b5   :  { %949 = vtanh.f32 %v754_v2  ;;  %v847_v26 = vmul.f32 -1.442695, %v754_v2 }
0x10b6   :  { %951 = vpow2.f32 %v846_v14 }
0x10c2   :  { %v950_v6 = vpop.eup %949 }
0x10c3   :  { %770 = vrot.lane.b32.xlu1 %v950_v6, %s962_s2  ;;  %v952_v19 = vpop.eup %951 }
0x10c4   :  { %v761_v20 = vadd.f32 1.0, %v952_v19 }
0x10c6   :  { %953 = vrcp.f32 %v761_v20 }
0x10d3   :  { %v954_v18 = vpop.eup %953 }
0x10d4   :  { %v768_v22 = vmul.f32 %v954_v18, %v692_v58 }
0x1135   :  { %v771_v21 = vpop.permute.xlu1 %770 }
0x1136   :  { %v773_v23 = vmul.f32 %v954_v18, %v771_v21 }
0x1138   :  { %775 = vrot.lane.b32.xlu0 %v773_v23, %s962_s2 }
0x11aa   :  { %v776_v24 = vpop.permute.xlu0 %775 }
0x11ab   :  { %v778_v25 = vadd.f32 %v776_v24, %v768_v22 }
0x11ad   :  { %955 = vtanh.f32 %v778_v25 }
0x11ae   :  { %957 = vpow2.f32 %v847_v26 }
0x11ba   :  { %v956_v16 = vpop.eup %955 }
0x11bb   :  { %781 = vrot.lane.b32.xlu1 %v956_v16, %s962_s2  ;;  %v958_v27 = vpop.eup %957 }
0x11bc   :  { %v762_v28 = vadd.f32 1.0, %v958_v27 }
0x11be   :  { %959 = vrcp.f32 %v762_v28 }
0x11cb   :  { %v960_v29 = vpop.eup %959 }
0x122d   :  { %v782_v30 = vpop.permute.xlu1 %781 }
0x122e   :  { %v784_v32 = vmul.f32 %v960_v29, %v782_v30 }
0x1230   :  { %v792_v33 = vmul.f32 %v848_v31, %v784_v32 }
0x1232   :  { %v793_v34 = vsel %vm95_vm0, %v792_v33, 0.0 }
0x1233   :  { %794 = vadd.xlane.f32.xlu0 %v793_v34 }
0x12bc   :  { %v795_v36 = vpop.xlane.xlu0 %794 }
0x12bd   :  { %v803_v37 = vadd.f32 %v849_v35, %v795_v36 }
0x12bf   :  { %805 = vst.msk [vmem:[%s1229_s6] sm:$0xff] %vm804_vm1, %v803_v37 }

</bundles_post_ra>
